<compile_context>
chip_gen: v6e
topology: v6e:2x2x1
jax: 0.10.0
libtpu: 0.0.40
codegen_flags: <defaults>
</compile_context>

<pallas_src>
import jax
import jax.numpy as jnp
from jax.experimental import pallas as pl
from jax.experimental.pallas import tpu as pltpu

DICE_SMOOTH = 1.0
DICE_EPS = 1e-8

_LANE = 128
_MAX_TILE_HW = 8192                 # upper bound on spatial tile width
_VMEM_BUDGET = 22 * 1024 * 1024     # working-set target (pipeline + spill)
_VMEM_LIMIT = 32 * 1024 * 1024      # scoped VMEM limit requested from Mosaic


def _loss_kernel(x_ref, y_ref, bce_ref, stats_ref, py_acc, p_acc, y_acc):
    k = pl.program_id(1)

    @pl.when(k == 0)
    def _():
        py_acc[...] = jnp.zeros_like(py_acc)
        p_acc[...] = jnp.zeros_like(p_acc)
        y_acc[...] = jnp.zeros_like(y_acc)

    x = x_ref[...].astype(jnp.float32)
    y = y_ref[...].astype(jnp.float32)

    # One shared exponential feeds both the numerically-stable BCE and the
    # sigmoid (robust_sigmoid's clamp to [0,1] is a no-op for this form).
    e = jnp.exp(-jnp.abs(x))
    bce = jnp.maximum(x, 0.0) - x * y + jnp.log1p(e)
    bce_ref[...] = bce.astype(bce_ref.dtype)

    s = 1.0 / (1.0 + e)                 # sigmoid(|x|)
    p = jnp.where(x >= 0, s, e * s)     # sigmoid(x), already in [0, 1]
    py = p * y

    # Accumulate sum(p*y), sum(p), sum(y); fp/fn are derived in the wrapper.
    # Chunk-wise adds keep the reduction on the VALU; the single cross-lane
    # reduce is deferred to the wrapper epilogue.
    acc_py = py_acc[...]
    acc_p = p_acc[...]
    acc_y = y_acc[...]
    n_chunks = x.shape[1] // _LANE
    for c in range(n_chunks):
        lo = c * _LANE
        acc_py = acc_py + py[:, lo:lo + _LANE]
        acc_p = acc_p + p[:, lo:lo + _LANE]
        acc_y = acc_y + y[:, lo:lo + _LANE]
    py_acc[...] = acc_py
    p_acc[...] = acc_p
    y_acc[...] = acc_y

    @pl.when(k == pl.num_programs(1) - 1)
    def _():
        stats_ref[:, 0 * _LANE:1 * _LANE] = py_acc[...]
        stats_ref[:, 1 * _LANE:2 * _LANE] = p_acc[...]
        stats_ref[:, 2 * _LANE:3 * _LANE] = y_acc[...]


def _choose_row_block(bc):
    """Row-block size: split rows so v7x's two TensorCores both get work, but
    only when blocks stay layout-friendly (multiple of 32 sublanes)."""
    if bc % 64 == 0:
        tm = bc // 2
        while tm > 256 and (tm // 2) % 32 == 0:
            tm //= 2
        return tm
    return bc  # single full-dimension row block (exempt from (8,128) rule)


def _choose_tile_hw(hw, tm, x_item, y_item, o_item):
    """Largest lane-multiple spatial tile that fits the VMEM budget."""
    # Per-element cost: double-buffered x/y inputs + bce output, plus an
    # allowance (~5 f32 temporaries) for in-kernel intermediates.
    bytes_per_elem = 2 * (x_item + y_item + o_item) + 20
    cap_cols = max(_LANE, _VMEM_BUDGET // max(1, tm * bytes_per_elem))
    cap_chunks = max(1, min(_MAX_TILE_HW, cap_cols) // _LANE)
    hw_chunks = -(-hw // _LANE)  # ceil(hw / 128)
    if hw % _LANE == 0:
        # Prefer a tile that divides HW exactly -> no padding pass needed.
        for c in range(min(cap_chunks, hw_chunks), 0, -1):
            if hw_chunks % c == 0:
                return c * _LANE
    return min(cap_chunks, hw_chunks) * _LANE


@jax.jit
def soft_dice_bce_with_logits_loss(net_output, target):
    """Returns (bce_loss [B,C,...], dice_loss scalar) like the PyTorch module."""
    shape = net_output.shape
    B, C = shape[0], shape[1]
    BC = B * C
    HW = 1
    for s in shape[2:]:
        HW *= s

    bce_dtype = net_output.dtype
    x2 = net_output.reshape(BC, HW)   # native dtype; kernel casts to f32
    y2 = target.reshape(BC, HW)

    tm = _choose_row_block(BC)
    tile_hw = _choose_tile_hw(
        HW, tm,
        jnp.dtype(x2.dtype).itemsize,
        jnp.dtype(y2.dtype).itemsize,
        jnp.dtype(bce_dtype).itemsize)
    hw_pad = -(-HW // tile_hw) * tile_hw
    if hw_pad != HW:
        # Padded logits of -1e9 give sigmoid == 0 and y == 0, so padding
        # contributes exactly nothing to the dice statistics; padded BCE
        # columns are sliced off below.
        x2 = jnp.pad(x2, ((0, 0), (0, hw_pad - HW)), constant_values=-1e9)
        y2 = jnp.pad(y2, ((0, 0), (0, hw_pad - HW)), constant_values=0)

    grid = (BC // tm, hw_pad // tile_hw)
    io_spec = pl.BlockSpec((tm, tile_hw), lambda r, k: (r, k))
    stats_spec = pl.BlockSpec((tm, 3 * _LANE), lambda r, k: (r, 0))

    bce2, stats = pl.pallas_call(
        _loss_kernel,
        out_shape=(
            jax.ShapeDtypeStruct((BC, hw_pad), bce_dtype),
            jax.ShapeDtypeStruct((BC, 3 * _LANE), jnp.float32),
        ),
        grid_spec=pltpu.PrefetchScalarGridSpec(
            num_scalar_prefetch=0,
            grid=grid,
            in_specs=[io_spec, io_spec],
            out_specs=(io_spec, stats_spec),
            scratch_shapes=[
                pltpu.VMEM((tm, _LANE), jnp.float32),   # sum(p*y)
                pltpu.VMEM((tm, _LANE), jnp.float32),   # sum(p)
                pltpu.VMEM((tm, _LANE), jnp.float32),   # sum(y)
            ],
        ),
        compiler_params=pltpu.CompilerParams(
            dimension_semantics=("parallel", "arbitrary"),
            vmem_limit_bytes=_VMEM_LIMIT,
        ),
    )(x2, y2)

    if hw_pad != HW:
        bce_loss = bce2[:, :HW].reshape(shape)
    else:
        bce_loss = bce2.reshape(shape)

    # Epilogue (hoisted out of the kernel): one cross-lane reduce + dice.
    sums = stats.reshape(BC, 3, _LANE).sum(axis=-1)
    tp = sums[:, 0]
    fp = sums[:, 1] - tp        # sum(p)     - sum(p*y)
    fn = sums[:, 2] - tp        # sum(y)     - sum(p*y)
    dc = (2.0 * tp + DICE_SMOOTH) / (2.0 * tp + fp + fn + DICE_SMOOTH + DICE_EPS)
    dsc_loss = 1.0 - jnp.mean(dc)
    return bce_loss, dsc_loss


def _reference(x, y):
    """Pure-JAX reference matching the PyTorch forward."""
    x = x.astype(jnp.float32)
    y = y.astype(jnp.float32)
    bce = jnp.maximum(x, 0.0) - x * y + jnp.log1p(jnp.exp(-jnp.abs(x)))
    p = jnp.clip(jax.nn.sigmoid(x), 0.0, 1.0)
    axes = tuple(range(2, x.ndim))
    tp = jnp.sum(p * y, axis=axes)
    fp = jnp.sum(p * (1.0 - y), axis=axes)
    fn = jnp.sum((1.0 - p) * y, axis=axes)
    dc = (2.0 * tp + DICE_SMOOTH) / (2.0 * tp + fp + fn + DICE_SMOOTH + DICE_EPS)
    return bce, 1.0 - jnp.mean(dc)


if __name__ == "__main__":
    key = jax.random.PRNGKey(0)
    kx, ky = jax.random.split(key)
    B, C, H, W = 2, 4, 16, 16
    net_output = jax.random.normal(kx, (B, C, H, W), dtype=jnp.float32)
    target = jax.random.bernoulli(ky, 0.5, (B, C, H, W)).astype(jnp.float32)

    bce_loss, dsc_loss = soft_dice_bce_with_logits_loss(net_output, target)
    jax.block_until_ready((bce_loss, dsc_loss))

    bce_ref, dsc_ref = _reference(net_output, target)
    assert bce_loss.shape == (B, C, H, W)
    assert jnp.allclose(bce_loss, bce_ref, atol=1e-5, rtol=1e-5)
    assert jnp.allclose(dsc_loss, dsc_ref, atol=1e-5, rtol=1e-5)
    print("KERNEL_OK")
</pallas_src>

<mosaic_0001>
module attributes {stable_mosaic.version = 11 : i64} {
  func.func @_loss_kernel(%arg0: i32, %arg1: i32, %arg2: memref<8x256xf32, #tpu.memory_space<vmem>>, %arg3: memref<8x256xf32, #tpu.memory_space<vmem>>, %arg4: memref<8x256xf32, #tpu.memory_space<vmem>>, %arg5: memref<8x384xf32, #tpu.memory_space<vmem>>, %arg6: memref<8x128xf32, #tpu.memory_space<vmem>>, %arg7: memref<8x128xf32, #tpu.memory_space<vmem>>, %arg8: memref<8x128xf32, #tpu.memory_space<vmem>>) attributes {dimension_semantics = [#tpu.dimension_semantics<parallel>, #tpu.dimension_semantics<arbitrary>], iteration_bounds = array<i64: 1, 1>, scalar_prefetch = 0 : i64, scratch_operands = 3 : i64, tpu.core_type = #tpu.core_type<tc>, window_params = [{transform_indices = @transform_0, window_bounds = array<i64: 8, 256>}, {transform_indices = @transform_1, window_bounds = array<i64: 8, 256>}, {transform_indices = @transform_2, window_bounds = array<i64: 8, 256>}, {transform_indices = @transform_3, window_bounds = array<i64: 8, 384>}]} {
    %c0_i32 = arith.constant 0 : i32
    %0 = arith.cmpi eq, %arg1, %c0_i32 : i32
    %1 = arith.extui %0 : i1 to i32
    %c0_i32_0 = arith.constant 0 : i32
    %2 = arith.cmpi ne, %1, %c0_i32_0 : i32
    scf.if %2 {
      %cst_24 = arith.constant 0.000000e+00 : f32
      %46 = vector.broadcast %cst_24 : f32 to vector<8x128xf32>
      %c0_25 = arith.constant 0 : index
      %c0_26 = arith.constant 0 : index
      %47 = vector.load %arg6[%c0_25, %c0_26] : memref<8x128xf32, #tpu.memory_space<vmem>>, vector<8x128xf32>
      tpu.vector_store %arg6[%c0_25, %c0_26], %46 {strides = array<i32>} : memref<8x128xf32, #tpu.memory_space<vmem>>, vector<8x128xf32>,
      %cst_27 = arith.constant 0.000000e+00 : f32
      %48 = vector.broadcast %cst_27 : f32 to vector<8x128xf32>
      %c0_28 = arith.constant 0 : index
      %c0_29 = arith.constant 0 : index
      %49 = vector.load %arg7[%c0_28, %c0_29] : memref<8x128xf32, #tpu.memory_space<vmem>>, vector<8x128xf32>
      tpu.vector_store %arg7[%c0_28, %c0_29], %48 {strides = array<i32>} : memref<8x128xf32, #tpu.memory_space<vmem>>, vector<8x128xf32>,
      %cst_30 = arith.constant 0.000000e+00 : f32
      %50 = vector.broadcast %cst_30 : f32 to vector<8x128xf32>
      %c0_31 = arith.constant 0 : index
      %c0_32 = arith.constant 0 : index
      %51 = vector.load %arg8[%c0_31, %c0_32] : memref<8x128xf32, #tpu.memory_space<vmem>>, vector<8x128xf32>
      tpu.vector_store %arg8[%c0_31, %c0_32], %50 {strides = array<i32>} : memref<8x128xf32, #tpu.memory_space<vmem>>, vector<8x128xf32>,
    } else {
    }
    %c0 = arith.constant 0 : index
    %c0_1 = arith.constant 0 : index
    %3 = vector.load %arg2[%c0, %c0_1] : memref<8x256xf32, #tpu.memory_space<vmem>>, vector<8x256xf32>
    %c0_2 = arith.constant 0 : index
    %c0_3 = arith.constant 0 : index
    %4 = vector.load %arg3[%c0_2, %c0_3] : memref<8x256xf32, #tpu.memory_space<vmem>>, vector<8x256xf32>
    %5 = math.absf %3 : vector<8x256xf32>
    %cst = arith.constant 0.000000e+00 : f32
    %6 = vector.broadcast %cst : f32 to vector<8x256xf32>
    %7 = arith.subf %6, %5 : vector<8x256xf32>
    %8 = math.exp %7 : vector<8x256xf32>
    %cst_4 = arith.constant 0.000000e+00 : f32
    %9 = vector.broadcast %cst_4 : f32 to vector<8x256xf32>
    %10 = arith.maximumf %3, %9 : vector<8x256xf32>
    %11 = arith.mulf %3, %4 : vector<8x256xf32>
    %12 = arith.subf %10, %11 : vector<8x256xf32>
    %13 = math.log1p %8 : vector<8x256xf32>
    %14 = arith.addf %12, %13 : vector<8x256xf32>
    %c0_5 = arith.constant 0 : index
    %c0_6 = arith.constant 0 : index
    %15 = vector.load %arg4[%c0_5, %c0_6] : memref<8x256xf32, #tpu.memory_space<vmem>>, vector<8x256xf32>
    tpu.vector_store %arg4[%c0_5, %c0_6], %14 {strides = array<i32>} : memref<8x256xf32, #tpu.memory_space<vmem>>, vector<8x256xf32>,
    %cst_7 = arith.constant 1.000000e+00 : f32
    %16 = vector.broadcast %cst_7 : f32 to vector<8x256xf32>
    %17 = arith.addf %16, %8 : vector<8x256xf32>
    %cst_8 = arith.constant 1.000000e+00 : f32
    %18 = vector.broadcast %cst_8 : f32 to vector<8x256xf32>
    %19 = arith.divf %18, %17 : vector<8x256xf32>
    %cst_9 = arith.constant 0.000000e+00 : f32
    %20 = vector.broadcast %cst_9 : f32 to vector<8x256xf32>
    %21 = arith.cmpf oge, %3, %20 : vector<8x256xf32>
    %22 = arith.mulf %8, %19 : vector<8x256xf32>
    %23 = arith.select %21, %19, %22 : vector<8x256xi1>, vector<8x256xf32>
    %24 = arith.mulf %23, %4 : vector<8x256xf32>
    %c0_10 = arith.constant 0 : index
    %c0_11 = arith.constant 0 : index
    %25 = vector.load %arg6[%c0_10, %c0_11] : memref<8x128xf32, #tpu.memory_space<vmem>>, vector<8x128xf32>
    %c0_12 = arith.constant 0 : index
    %c0_13 = arith.constant 0 : index
    %26 = vector.load %arg7[%c0_12, %c0_13] : memref<8x128xf32, #tpu.memory_space<vmem>>, vector<8x128xf32>
    %c0_14 = arith.constant 0 : index
    %c0_15 = arith.constant 0 : index
    %27 = vector.load %arg8[%c0_14, %c0_15] : memref<8x128xf32, #tpu.memory_space<vmem>>, vector<8x128xf32>
    %28 = vector.extract_strided_slice %24 {offsets = [0, 0], sizes = [8, 128], strides = [1, 1]} : vector<8x256xf32> to vector<8x128xf32>
    %29 = arith.addf %25, %28 : vector<8x128xf32>
    %30 = vector.extract_strided_slice %23 {offsets = [0, 0], sizes = [8, 128], strides = [1, 1]} : vector<8x256xf32> to vector<8x128xf32>
    %31 = arith.addf %26, %30 : vector<8x128xf32>
    %32 = vector.extract_strided_slice %4 {offsets = [0, 0], sizes = [8, 128], strides = [1, 1]} : vector<8x256xf32> to vector<8x128xf32>
    %33 = arith.addf %27, %32 : vector<8x128xf32>
    %34 = vector.extract_strided_slice %24 {offsets = [0, 128], sizes = [8, 128], strides = [1, 1]} : vector<8x256xf32> to vector<8x128xf32>
    %35 = arith.addf %29, %34 : vector<8x128xf32>
    %36 = vector.extract_strided_slice %23 {offsets = [0, 128], sizes = [8, 128], strides = [1, 1]} : vector<8x256xf32> to vector<8x128xf32>
    %37 = arith.addf %31, %36 : vector<8x128xf32>
    %38 = vector.extract_strided_slice %4 {offsets = [0, 128], sizes = [8, 128], strides = [1, 1]} : vector<8x256xf32> to vector<8x128xf32>
    %39 = arith.addf %33, %38 : vector<8x128xf32>
    %c0_16 = arith.constant 0 : index
    %c0_17 = arith.constant 0 : index
    %40 = vector.load %arg6[%c0_16, %c0_17] : memref<8x128xf32, #tpu.memory_space<vmem>>, vector<8x128xf32>
    tpu.vector_store %arg6[%c0_16, %c0_17], %35 {strides = array<i32>} : memref<8x128xf32, #tpu.memory_space<vmem>>, vector<8x128xf32>,
    %c0_18 = arith.constant 0 : index
    %c0_19 = arith.constant 0 : index
    %41 = vector.load %arg7[%c0_18, %c0_19] : memref<8x128xf32, #tpu.memory_space<vmem>>, vector<8x128xf32>
    tpu.vector_store %arg7[%c0_18, %c0_19], %37 {strides = array<i32>} : memref<8x128xf32, #tpu.memory_space<vmem>>, vector<8x128xf32>,
    %c0_20 = arith.constant 0 : index
    %c0_21 = arith.constant 0 : index
    %42 = vector.load %arg8[%c0_20, %c0_21] : memref<8x128xf32, #tpu.memory_space<vmem>>, vector<8x128xf32>
    tpu.vector_store %arg8[%c0_20, %c0_21], %39 {strides = array<i32>} : memref<8x128xf32, #tpu.memory_space<vmem>>, vector<8x128xf32>,
    %c0_i32_22 = arith.constant 0 : i32
    %43 = arith.cmpi eq, %arg1, %c0_i32_22 : i32
    %44 = arith.extui %43 : i1 to i32
    %c0_i32_23 = arith.constant 0 : i32
    %45 = arith.cmpi ne, %44, %c0_i32_23 : i32
    scf.if %45 {
      %c0_24 = arith.constant 0 : index
      %c0_25 = arith.constant 0 : index
      %46 = vector.load %arg6[%c0_24, %c0_25] : memref<8x128xf32, #tpu.memory_space<vmem>>, vector<8x128xf32>
      %c0_26 = arith.constant 0 : index
      %c0_27 = arith.constant 0 : index
      %47 = vector.load %arg5[%c0_26, %c0_27] : memref<8x384xf32, #tpu.memory_space<vmem>>, vector<8x128xf32>
      tpu.vector_store %arg5[%c0_26, %c0_27], %46 {strides = array<i32>} : memref<8x384xf32, #tpu.memory_space<vmem>>, vector<8x128xf32>,
      %c0_28 = arith.constant 0 : index
      %c0_29 = arith.constant 0 : index
      %48 = vector.load %arg7[%c0_28, %c0_29] : memref<8x128xf32, #tpu.memory_space<vmem>>, vector<8x128xf32>
      %c0_30 = arith.constant 0 : index
      %c128 = arith.constant 128 : index
      %49 = vector.load %arg5[%c0_30, %c128] : memref<8x384xf32, #tpu.memory_space<vmem>>, vector<8x128xf32>
      tpu.vector_store %arg5[%c0_30, %c128], %48 {strides = array<i32>} : memref<8x384xf32, #tpu.memory_space<vmem>>, vector<8x128xf32>,
      %c0_31 = arith.constant 0 : index
      %c0_32 = arith.constant 0 : index
      %50 = vector.load %arg8[%c0_31, %c0_32] : memref<8x128xf32, #tpu.memory_space<vmem>>, vector<8x128xf32>
      %c0_33 = arith.constant 0 : index
      %c256 = arith.constant 256 : index
      %51 = vector.load %arg5[%c0_33, %c256] : memref<8x384xf32, #tpu.memory_space<vmem>>, vector<8x128xf32>
      tpu.vector_store %arg5[%c0_33, %c256], %50 {strides = array<i32>} : memref<8x384xf32, #tpu.memory_space<vmem>>, vector<8x128xf32>,
    } else {
    }
    return
  }
  func.func @transform_0(%arg0: i32, %arg1: i32) -> (i32, i32) {
    %c0_i32 = arith.constant 0 : i32
    return %arg0, %arg1 : i32, i32
  }
  func.func @transform_1(%arg0: i32, %arg1: i32) -> (i32, i32) {
    %c0_i32 = arith.constant 0 : i32
    return %arg0, %arg1 : i32, i32
  }
  func.func @transform_2(%arg0: i32, %arg1: i32) -> (i32, i32) {
    %c0_i32 = arith.constant 0 : i32
    return %arg0, %arg1 : i32, i32
  }
  func.func @transform_3(%arg0: i32, %arg1: i32) -> (i32, i32) {
    %c0_i32 = arith.constant 0 : i32
    %c0_i32_0 = arith.constant 0 : i32
    return %arg0, %c0_i32 : i32, i32
  }
}

</mosaic_0001>

<bundles_post_ra>
// kernel: soft_dice_bce_with_logits_loss.1
= control target key start
LH: loop header
LB: loop body
LE: loop exit
PB: predicated region body
PF: predicated region fallthrough
CT: control target
= control target key end

     0   :  { %s162_s0 = inlined_call_operand.vmem [shape: f32[8,256], index: 0, kind: input, shape index: {}]   ;;  %s163_s1 = inlined_call_operand.vmem [shape: f32[8,256], index: 1, kind: input, shape index: {}]   ;;  %s164_s3 = inlined_call_operand.vmem [shape: f32[8,384], index: 3, kind: output, shape index: {1}]   ;;  %s165_s2 = inlined_call_operand.vmem [shape: f32[8,256], index: 2, kind: output, shape index: {0}]  }
   0x1   :  { %v20_v0 = vld [vmem:[%s162_s0] sm:$0xff]  ;;  %v21_v1 = vld [vmem:[%s162_s0 + $0x8] sm:$0xff] }
   0x2   :  { %v24_v2 = vand.u32 2147483647, %v20_v0  ;;  %v25_v3 = vand.u32 2147483647, %v21_v1  ;;  %v22_v4 = vld [vmem:[%s163_s1] sm:$0xff]  ;;  %v23_v5 = vld [vmem:[%s163_s1 + $0x8] sm:$0xff] }
   0x3   :  { %v82_v8 = vadd.f32 %v23_v5, %v22_v4  ;;  %v32_v18 = vmax.f32 %v20_v0, 0.0  ;;  %v34_v19 = vmul.f32 %v22_v4, %v20_v0  ;;  %v33_v22 = vmax.f32 %v21_v1, 0.0 }
   0x4   :  { %v26_v6 = vsub.f32 0.0, %v24_v2  ;;  %v27_v7 = vsub.f32 0.0, %v25_v3  ;;  %v35_v23 = vmul.f32 %v23_v5, %v21_v1  ;;  %vm66_vm1 = vcmp.ge.f32.partialorder %v20_v0, 0.0 }
   0x5   :  { %94 = vst [vmem:[%s164_s3 + $0x10] sm:$0xff] %v82_v8  ;;  %v36_v27 = vsub.f32 %v32_v18, %v34_v19  ;;  %vm67_vm3 = vcmp.ge.f32.partialorder %v21_v1, 0.0 }
   0x6   :  { %v28_v9 = vmul.f32 1.442695, %v26_v6  ;;  %v30_v10 = vmul.f32 1.442695, %v27_v7  ;;  %v37_v32 = vsub.f32 %v33_v22, %v35_v23 }
   0x8   :  { %103 = vpow2.f32 %v28_v9 }
   0x9   :  { %105 = vpow2.f32 %v30_v10 }
  0x15   :  { %v104_v11 = vpop.eup %103 }
  0x16   :  { %v106_v12 = vpop.eup %105  ;;  %v38_v13 = vadd.f32 1.0, %v104_v11  ;;  %v41_v15 = vmul.f32 -0.5, %v104_v11  ;;  %v44_v20 = vand.u32 2147483647, %v104_v11 }
  0x17   :  { %v47_v14 = vadd.f32 1.0, %v106_v12  ;;  %v50_v16 = vmul.f32 -0.5, %v106_v12  ;;  %v53_v24 = vand.u32 2147483647, %v106_v12 }
  0x18   :  { %107 = vlog2.f32 %v38_v13  ;;  %v42_v17 = vadd.f32 1.0, %v41_v15  ;;  %vm45_vm0 = vcmp.lt.f32.partialorder %v44_v20, 0.0004427343 }
  0x19   :  { %109 = vrcp.f32 %v38_v13  ;;  %v51_v21 = vadd.f32 1.0, %v50_v16  ;;  %vm54_vm2 = vcmp.lt.f32.partialorder %v53_v24, 0.0004427343 }
  0x1a   :  { %111 = vlog2.f32 %v47_v14  ;;  %v43_v25 = vmul.f32 %v104_v11, %v42_v17 }
  0x1b   :  { %113 = vrcp.f32 %v47_v14  ;;  %v52_v30 = vmul.f32 %v106_v12, %v51_v21 }
  0x25   :  { %v108_v26 = vpop.eup %107 }
  0x26   :  { %v110_v28 = vpop.eup %109  ;;  %v40_v29 = vmul.f32 0.6931472, %v108_v26 }
  0x27   :  { %v112_v31 = vpop.eup %111  ;;  %v68_v33 = vmul.f32 %v110_v28, %v104_v11 }
  0x28   :  { %v114_v34 = vpop.eup %113  ;;  %v46_v35 = vsel %vm45_vm0, %v43_v25, %v40_v29  ;;  %v49_v36 = vmul.f32 0.6931472, %v112_v31 }
  0x29   :  { %v56_v37 = vadd.f32 %v46_v35, %v36_v27  ;;  %v69_v38 = vmul.f32 %v114_v34, %v106_v12  ;;  %v70_v39 = vsel %vm66_vm1, %v110_v28, %v68_v33 }
  0x2a   :  { %v55_v40 = vsel %vm54_vm2, %v52_v30, %v49_v36  ;;  %v72_v41 = vmul.f32 %v70_v39, %v22_v4 }
  0x2b   :  { %58 = vst [vmem:[%s165_s2] sm:$0xff] %v56_v37  ;;  %v57_v42 = vadd.f32 %v55_v40, %v37_v32  ;;  %v71_v43 = vsel %vm67_vm3, %v114_v34, %v69_v38 }
  0x2c   :  { %v73_v44 = vmul.f32 %v71_v43, %v23_v5  ;;  %v81_v45 = vadd.f32 %v71_v43, %v70_v39 }
  0x2d   :  { %59 = vst [vmem:[%s165_s2 + $0x8] sm:$0xff] %v57_v42 }
  0x2e   :  { %v80_v46 = vadd.f32 %v73_v44, %v72_v41  ;;  %92 = vst [vmem:[%s164_s3 + $0x8] sm:$0xff] %v81_v45 }
  0x30   :  { %90 = vst [vmem:[%s164_s3] sm:$0xff] %v80_v46 }

</bundles_post_ra>
